<compile_context>
chip_gen: v7x
topology: tpu7x:2x2x1
jax: 0.10.0
libtpu: 0.0.40
codegen_flags: <defaults>
</compile_context>

<pallas_src>
import functools

import jax
import jax.numpy as jnp
from jax import lax
from jax.experimental import pallas as pl
from jax.experimental.pallas import tpu as pltpu


def _round_up(x, m):
    return (x + m - 1) // m * m


# ---------------------------------------------------------------------------
# Fused kernel: (conv3x3 + BN + ReLU) x 2 over Nb images packed along lanes,
# channels on sublanes / matmul M & K dims, flattened padded spatial on lanes.
# ---------------------------------------------------------------------------
def _down_double_conv_kernel(
    x_ref, w1_ref, s1_ref, b1_ref, w2_ref, s2_ref, b2_ref, mask_ref,
    o_ref,
    xpad_ref, xc1_ref, yext_ref, xc2_ref,
    *, Cin, Cmid, Nb, Wp, F_pad, G,
):
    # x_ref   : (Nb, Cin, F_pad)     halo-padded, lane-padded, flattened pooled frames
    # w1_ref  : (Cmid, K1)           conv1 weights, 9 taps densely folded into K
    # w2_ref  : (Cout, K2)           conv2 weights, same layout
    # s*/b*   : (C, 1)               fused BN scale / shift (conv bias folded in)
    # mask_ref: (1, Nb*F_pad)        1.0 on interior pixels, 0.0 on halo / dead lanes
    # o_ref   : (Nb, Cout, F_pad)    conv2 output over the padded frames (halo cropped by wrapper)
    # xpad_ref: (Cin, L+2G)   VMEM   guarded staging of the packed frames
    # xc1_ref : (K1, L)       VMEM   im2col operand for conv1
    # yext_ref: (Cmid, L+2G)  VMEM   conv1 output with zero guard bands
    # xc2_ref : (K2, L)       VMEM   im2col operand for conv2
    L = Nb * F_pad
    offs = [dy * Wp + dx for dy in (-1, 0, 1) for dx in (-1, 0, 1)]

    # Zero the guard bands / dead K rows ONCE; every data region below is fully
    # overwritten each grid step, so this stays correct across iterations.
    @pl.when(pl.program_id(0) == 0)
    def _init():
        xpad_ref[...] = jnp.zeros(xpad_ref.shape, jnp.float32)
        xc1_ref[...] = jnp.zeros(xc1_ref.shape, jnp.float32)
        yext_ref[...] = jnp.zeros(yext_ref.shape, jnp.float32)
        xc2_ref[...] = jnp.zeros(xc2_ref.shape, jnp.float32)

    # Stage the Nb lane-dense frames side by side between the zero guard bands.
    for i in range(Nb):
        xpad_ref[:, G + i * F_pad:G + (i + 1) * F_pad] = x_ref[i]

    # im2col for conv1: 9 shifted lane views stacked on K (tap-major, channel-minor, dense).
    for k, off in enumerate(offs):
        xc1_ref[k * Cin:(k + 1) * Cin, :] = xpad_ref[:, G + off:G + off + L]

    # conv1 as ONE MXU matmul + fused BN/bias + ReLU; mask restores the zero halo before conv2.
    y1 = jnp.dot(w1_ref[...], xc1_ref[...], preferred_element_type=jnp.float32)
    y1 = jnp.maximum(y1 * s1_ref[...] + b1_ref[...], 0.0) * mask_ref[...]

    # Stage conv1 output with zero guards so conv2 taps are plain contiguous lane slices.
    yext_ref[:, G:G + L] = y1
    for k, off in enumerate(offs):
        xc2_ref[k * Cmid:(k + 1) * Cmid, :] = yext_ref[:, G + off:G + off + L]

    # conv2 + fused BN/bias + ReLU; per-image stores are 128-aligned, full-lane slabs.
    y2 = jnp.dot(w2_ref[...], xc2_ref[...], preferred_element_type=jnp.float32)
    y2 = jnp.maximum(y2 * s2_ref[...] + b2_ref[...], 0.0).astype(o_ref.dtype)
    for i in range(Nb):
        o_ref[i] = y2[:, i * F_pad:(i + 1) * F_pad]


# ---------------------------------------------------------------------------
# Wrapper glue (layout / folding; cheap, fused XLA ops)
# ---------------------------------------------------------------------------
def _fuse_bn(bias, gamma, beta, mean, var, eps):
    s = gamma / jnp.sqrt(var + eps)
    return s.astype(jnp.float32), (beta + (bias - mean) * s).astype(jnp.float32)


def _fold_taps_into_k(w_hwio, kpad):
    # (3, 3, Cin, Cout) -> (Cout, kpad): tap-major / channel-minor along K, densely packed,
    # zero-padded to a sublane multiple only at the very end of K.
    kh, kw, ci, co = w_hwio.shape
    w = jnp.transpose(w_hwio, (3, 0, 1, 2)).reshape(co, kh * kw * ci)
    return jnp.pad(w, ((0, 0), (0, kpad - kh * kw * ci))).astype(jnp.float32)


def _pick_images_per_block(batch, f_pad, lane_budget=1024):
    # Largest divisor of the batch whose packed lane slab stays a modest number of vregs wide.
    nb = 1
    for cand in range(1, batch + 1):
        if batch % cand == 0 and cand * f_pad <= lane_budget:
            nb = cand
    return nb


@functools.partial(jax.jit, static_argnames=("images_per_block", "eps"))
def down_forward(x_nchw, params, images_per_block=None, eps=1e-5):
    B, Cin, H, W = x_nchw.shape
    Cmid = params["w1"].shape[-1]
    Cout = params["w2"].shape[-1]
    Ho, Wo = H // 2, W // 2
    Hp, Wp = Ho + 2, Wo + 2               # zero-padded (pad=1) frame for the 3x3 convs
    F = Hp * Wp                           # flattened padded frame
    F_pad = _round_up(F, 128)             # lane-dense frame slot (128-multiple)
    G = _round_up(Wp + 1, 8)              # lane guard >= largest tap offset (small, VMEM-only)
    K1 = _round_up(9 * Cin, 8)            # densely packed im2col K, rounded to a sublane multiple
    K2 = _round_up(9 * Cmid, 8)

    Nb = images_per_block if images_per_block is not None else _pick_images_per_block(B, F_pad)
    if B % Nb != 0:
        raise ValueError(f"images_per_block={Nb} must divide batch={B}")
    L = Nb * F_pad

    x = x_nchw.astype(jnp.float32)[:, :, :2 * Ho, :2 * Wo]

    # MaxPool2d(2) + conv halo pad + flatten + lane pad: one fused XLA prologue, stays NCHW.
    pooled = jnp.maximum(
        jnp.maximum(x[:, :, 0::2, 0::2], x[:, :, 0::2, 1::2]),
        jnp.maximum(x[:, :, 1::2, 0::2], x[:, :, 1::2, 1::2]))          # (B, Cin, Ho, Wo)
    xin = jnp.pad(pooled, ((0, 0), (0, 0), (1, 1), (1, 1))).reshape(B, Cin, F)
    xin = jnp.pad(xin, ((0, 0), (0, 0), (0, F_pad - F)))                # (B, Cin, F_pad)

    # Fold conv bias + eval-mode BN into per-channel scale/shift (f32 epilogue).
    s1, sh1 = _fuse_bn(params["b1"], params["gamma1"], params["beta1"],
                       params["mean1"], params["var1"], eps)
    s2, sh2 = _fuse_bn(params["b2"], params["gamma2"], params["beta2"],
                       params["mean2"], params["var2"], eps)

    w1m = _fold_taps_into_k(params["w1"], K1)            # (Cmid, K1)
    w2m = _fold_taps_into_k(params["w2"], K2)            # (Cout, K2)

    # Interior mask (1 on real pixels, 0 on halo and dead lane padding), tiled per packed image.
    yy = lax.broadcasted_iota(jnp.int32, (Hp, Wp), 0)
    xx = lax.broadcasted_iota(jnp.int32, (Hp, Wp), 1)
    interior = (yy > 0) & (yy < Hp - 1) & (xx > 0) & (xx < Wp - 1)
    m = jnp.pad(interior.astype(jnp.float32).reshape(F), (0, F_pad - F))
    mask = jnp.tile(m, (Nb,)).reshape(1, L)

    kernel = functools.partial(
        _down_double_conv_kernel,
        Cin=Cin, Cmid=Cmid, Nb=Nb, Wp=Wp, F_pad=F_pad, G=G)

    out_full = pl.pallas_call(
        kernel,
        out_shape=jax.ShapeDtypeStruct((B, Cout, F_pad), jnp.float32),
        grid=(B // Nb,),
        in_specs=[
            pl.BlockSpec((Nb, Cin, F_pad), lambda b: (b, 0, 0)),
            pl.BlockSpec((Cmid, K1), lambda b: (0, 0)),
            pl.BlockSpec((Cmid, 1), lambda b: (0, 0)),
            pl.BlockSpec((Cmid, 1), lambda b: (0, 0)),
            pl.BlockSpec((Cout, K2), lambda b: (0, 0)),
            pl.BlockSpec((Cout, 1), lambda b: (0, 0)),
            pl.BlockSpec((Cout, 1), lambda b: (0, 0)),
            pl.BlockSpec((1, L), lambda b: (0, 0)),
        ],
        out_specs=pl.BlockSpec((Nb, Cout, F_pad), lambda b: (b, 0, 0)),
        scratch_shapes=[
            pltpu.VMEM((Cin, L + 2 * G), jnp.float32),
            pltpu.VMEM((K1, L), jnp.float32),
            pltpu.VMEM((Cmid, L + 2 * G), jnp.float32),
            pltpu.VMEM((K2, L), jnp.float32),
        ],
        compiler_params=pltpu.CompilerParams(dimension_semantics=("parallel",)),
    )(xin, w1m, s1.reshape(Cmid, 1), sh1.reshape(Cmid, 1),
      w2m, s2.reshape(Cout, 1), sh2.reshape(Cout, 1), mask)

    # Drop dead lanes, un-flatten, crop the conv halo: already NCHW.
    return out_full[:, :, :F].reshape(B, Cout, Hp, Wp)[:, :, 1:1 + Ho, 1:1 + Wo]


# ---------------------------------------------------------------------------
# Pure-JAX reference (for verification; eval-mode BN, matches the PyTorch module)
# ---------------------------------------------------------------------------
def ref_forward(x_nchw, params, eps=1e-5):
    x = jnp.transpose(x_nchw, (0, 2, 3, 1))
    x = lax.reduce_window(x, -jnp.inf, lax.max, (1, 2, 2, 1), (1, 2, 2, 1), "VALID")

    def block(x, w, b, g, bt, m, v):
        y = lax.conv_general_dilated(
            x, w, (1, 1), "SAME", dimension_numbers=("NHWC", "HWIO", "NHWC"))
        y = y + b
        y = (y - m) / jnp.sqrt(v + eps) * g + bt
        return jnp.maximum(y, 0.0)

    x = block(x, params["w1"], params["b1"], params["gamma1"], params["beta1"],
              params["mean1"], params["var1"])
    x = block(x, params["w2"], params["b2"], params["gamma2"], params["beta2"],
              params["mean2"], params["var2"])
    return jnp.transpose(x, (0, 3, 1, 2))


# ---------------------------------------------------------------------------
# Main
# ---------------------------------------------------------------------------
if __name__ == "__main__":
    B, Cin, H, W = 2, 4, 16, 16
    Cmid, Cout = 8, 8

    key = jax.random.PRNGKey(0)
    ks = jax.random.split(key, 13)

    params = {
        # conv1: in->mid, 3x3, HWIO layout
        "w1": jax.random.normal(ks[0], (3, 3, Cin, Cmid), jnp.float32) * 0.2,
        "b1": jax.random.normal(ks[1], (Cmid,), jnp.float32) * 0.1,
        "gamma1": jax.random.uniform(ks[2], (Cmid,), jnp.float32, 0.5, 1.5),
        "beta1": jax.random.normal(ks[3], (Cmid,), jnp.float32) * 0.1,
        "mean1": jax.random.normal(ks[4], (Cmid,), jnp.float32) * 0.1,
        "var1": jax.random.uniform(ks[5], (Cmid,), jnp.float32, 0.5, 1.5),
        # conv2: mid->out, 3x3
        "w2": jax.random.normal(ks[6], (3, 3, Cmid, Cout), jnp.float32) * 0.2,
        "b2": jax.random.normal(ks[7], (Cout,), jnp.float32) * 0.1,
        "gamma2": jax.random.uniform(ks[8], (Cout,), jnp.float32, 0.5, 1.5),
        "beta2": jax.random.normal(ks[9], (Cout,), jnp.float32) * 0.1,
        "mean2": jax.random.normal(ks[10], (Cout,), jnp.float32) * 0.1,
        "var2": jax.random.uniform(ks[11], (Cout,), jnp.float32, 0.5, 1.5),
    }

    x = jax.random.normal(ks[12], (B, Cin, H, W), jnp.float32)

    ref = jax.block_until_ready(ref_forward(x, params))

    # Default: images packed along the lane axis (Nb=2 here -> grid=(1,)).
    out = jax.block_until_ready(down_forward(x, params))
    assert out.shape == (B, Cout, H // 2, W // 2), out.shape
    err = float(jnp.max(jnp.abs(out - ref)))
    assert jnp.allclose(out, ref, atol=2e-3, rtol=2e-3), err

    # Also validate the unpacked path (grid=(B,), one image per step; the v7x-megacore layout).
    out1 = jax.block_until_ready(down_forward(x, params, images_per_block=1))
    err1 = float(jnp.max(jnp.abs(out1 - ref)))
    assert jnp.allclose(out1, ref, atol=2e-3, rtol=2e-3), err1

    print("KERNEL_OK")
</pallas_src>

<mosaic_0001>
module attributes {stable_mosaic.version = 11 : i64} {
  func.func @_down_double_conv_kernel(%arg0: i32, %arg1: memref<2x4x128xf32, #tpu.memory_space<vmem>>, %arg2: memref<8x40xf32, #tpu.memory_space<vmem>>, %arg3: memref<8x1xf32, #tpu.memory_space<vmem>>, %arg4: memref<8x1xf32, #tpu.memory_space<vmem>>, %arg5: memref<8x72xf32, #tpu.memory_space<vmem>>, %arg6: memref<8x1xf32, #tpu.memory_space<vmem>>, %arg7: memref<8x1xf32, #tpu.memory_space<vmem>>, %arg8: memref<1x256xf32, #tpu.memory_space<vmem>>, %arg9: memref<2x8x128xf32, #tpu.memory_space<vmem>>, %arg10: memref<4x288xf32, #tpu.memory_space<vmem>>, %arg11: memref<40x256xf32, #tpu.memory_space<vmem>>, %arg12: memref<8x288xf32, #tpu.memory_space<vmem>>, %arg13: memref<72x256xf32, #tpu.memory_space<vmem>>) attributes {dimension_semantics = [#tpu.dimension_semantics<parallel>], iteration_bounds = array<i64: 1>, scalar_prefetch = 0 : i64, scratch_operands = 4 : i64, tpu.core_type = #tpu.core_type<tc>, window_params = [{transform_indices = @transform_0, window_bounds = array<i64: 2, 4, 128>}, {pipeline_mode = #tpu.pipeline_mode<synchronous>, transform_indices = @transform_1, window_bounds = array<i64: 8, 40>}, {pipeline_mode = #tpu.pipeline_mode<synchronous>, transform_indices = @transform_2, window_bounds = array<i64: 8, 1>}, {pipeline_mode = #tpu.pipeline_mode<synchronous>, transform_indices = @transform_3, window_bounds = array<i64: 8, 1>}, {pipeline_mode = #tpu.pipeline_mode<synchronous>, transform_indices = @transform_4, window_bounds = array<i64: 8, 72>}, {pipeline_mode = #tpu.pipeline_mode<synchronous>, transform_indices = @transform_5, window_bounds = array<i64: 8, 1>}, {pipeline_mode = #tpu.pipeline_mode<synchronous>, transform_indices = @transform_6, window_bounds = array<i64: 8, 1>}, {pipeline_mode = #tpu.pipeline_mode<synchronous>, transform_indices = @transform_7, window_bounds = array<i64: 1, 256>}, {transform_indices = @transform_8, window_bounds = array<i64: 2, 8, 128>}]} {
    %c0_i32 = arith.constant 0 : i32
    %0 = arith.cmpi eq, %arg0, %c0_i32 : i32
    %1 = arith.extui %0 : i1 to i32
    %c0_i32_0 = arith.constant 0 : i32
    %2 = arith.cmpi ne, %1, %c0_i32_0 : i32
    scf.if %2 {
      %cst_89 = arith.constant 0.000000e+00 : f32
      %79 = vector.broadcast %cst_89 : f32 to vector<4x288xf32>
      %c0_90 = arith.constant 0 : index
      %c0_91 = arith.constant 0 : index
      %80 = vector.load %arg10[%c0_90, %c0_91] : memref<4x288xf32, #tpu.memory_space<vmem>>, vector<4x288xf32>
      tpu.vector_store %arg10[%c0_90, %c0_91], %79 {strides = array<i32>} : memref<4x288xf32, #tpu.memory_space<vmem>>, vector<4x288xf32>,
      %cst_92 = arith.constant 0.000000e+00 : f32
      %81 = vector.broadcast %cst_92 : f32 to vector<40x256xf32>
      %c0_93 = arith.constant 0 : index
      %c0_94 = arith.constant 0 : index
      %82 = vector.load %arg11[%c0_93, %c0_94] : memref<40x256xf32, #tpu.memory_space<vmem>>, vector<40x256xf32>
      tpu.vector_store %arg11[%c0_93, %c0_94], %81 {strides = array<i32>} : memref<40x256xf32, #tpu.memory_space<vmem>>, vector<40x256xf32>,
      %cst_95 = arith.constant 0.000000e+00 : f32
      %83 = vector.broadcast %cst_95 : f32 to vector<8x288xf32>
      %c0_96 = arith.constant 0 : index
      %c0_97 = arith.constant 0 : index
      %84 = vector.load %arg12[%c0_96, %c0_97] : memref<8x288xf32, #tpu.memory_space<vmem>>, vector<8x288xf32>
      tpu.vector_store %arg12[%c0_96, %c0_97], %83 {strides = array<i32>} : memref<8x288xf32, #tpu.memory_space<vmem>>, vector<8x288xf32>,
      %cst_98 = arith.constant 0.000000e+00 : f32
      %85 = vector.broadcast %cst_98 : f32 to vector<72x256xf32>
      %c0_99 = arith.constant 0 : index
      %c0_100 = arith.constant 0 : index
      %86 = vector.load %arg13[%c0_99, %c0_100] : memref<72x256xf32, #tpu.memory_space<vmem>>, vector<72x256xf32>
      tpu.vector_store %arg13[%c0_99, %c0_100], %85 {strides = array<i32>} : memref<72x256xf32, #tpu.memory_space<vmem>>, vector<72x256xf32>,
    } else {
    }
    %c0 = arith.constant 0 : index
    %c0_1 = arith.constant 0 : index
    %c0_2 = arith.constant 0 : index
    %3 = vector.load %arg1[%c0, %c0_1, %c0_2] : memref<2x4x128xf32, #tpu.memory_space<vmem>>, vector<1x4x128xf32>
    %4 = vector.shape_cast %3 : vector<1x4x128xf32> to vector<4x128xf32>
    %c0_3 = arith.constant 0 : index
    %c16 = arith.constant 16 : index
    %5 = vector.load %arg10[%c0_3, %c16] : memref<4x288xf32, #tpu.memory_space<vmem>>, vector<4x128xf32>
    tpu.vector_store %arg10[%c0_3, %c16], %4 {strides = array<i32>} : memref<4x288xf32, #tpu.memory_space<vmem>>, vector<4x128xf32>,
    %c1 = arith.constant 1 : index
    %c0_4 = arith.constant 0 : index
    %c0_5 = arith.constant 0 : index
    %6 = vector.load %arg1[%c1, %c0_4, %c0_5] : memref<2x4x128xf32, #tpu.memory_space<vmem>>, vector<1x4x128xf32>
    %7 = vector.shape_cast %6 : vector<1x4x128xf32> to vector<4x128xf32>
    %c0_6 = arith.constant 0 : index
    %c144 = arith.constant 144 : index
    %8 = vector.load %arg10[%c0_6, %c144] : memref<4x288xf32, #tpu.memory_space<vmem>>, vector<4x128xf32>
    tpu.vector_store %arg10[%c0_6, %c144], %7 {strides = array<i32>} : memref<4x288xf32, #tpu.memory_space<vmem>>, vector<4x128xf32>,
    %c0_7 = arith.constant 0 : index
    %c5 = arith.constant 5 : index
    %9 = vector.load %arg10[%c0_7, %c5] : memref<4x288xf32, #tpu.memory_space<vmem>>, vector<4x256xf32>
    %c0_8 = arith.constant 0 : index
    %c0_9 = arith.constant 0 : index
    %10 = vector.load %arg11[%c0_8, %c0_9] : memref<40x256xf32, #tpu.memory_space<vmem>>, vector<4x256xf32>
    tpu.vector_store %arg11[%c0_8, %c0_9], %9 {strides = array<i32>} : memref<40x256xf32, #tpu.memory_space<vmem>>, vector<4x256xf32>,
    %c0_10 = arith.constant 0 : index
    %c6 = arith.constant 6 : index
    %11 = vector.load %arg10[%c0_10, %c6] : memref<4x288xf32, #tpu.memory_space<vmem>>, vector<4x256xf32>
    %c4 = arith.constant 4 : index
    %c0_11 = arith.constant 0 : index
    %12 = vector.load %arg11[%c4, %c0_11] : memref<40x256xf32, #tpu.memory_space<vmem>>, vector<4x256xf32>
    tpu.vector_store %arg11[%c4, %c0_11], %11 {strides = array<i32>} : memref<40x256xf32, #tpu.memory_space<vmem>>, vector<4x256xf32>,
    %c0_12 = arith.constant 0 : index
    %c7 = arith.constant 7 : index
    %13 = vector.load %arg10[%c0_12, %c7] : memref<4x288xf32, #tpu.memory_space<vmem>>, vector<4x256xf32>
    %c8 = arith.constant 8 : index
    %c0_13 = arith.constant 0 : index
    %14 = vector.load %arg11[%c8, %c0_13] : memref<40x256xf32, #tpu.memory_space<vmem>>, vector<4x256xf32>
    tpu.vector_store %arg11[%c8, %c0_13], %13 {strides = array<i32>} : memref<40x256xf32, #tpu.memory_space<vmem>>, vector<4x256xf32>,
    %c0_14 = arith.constant 0 : index
    %c15 = arith.constant 15 : index
    %15 = vector.load %arg10[%c0_14, %c15] : memref<4x288xf32, #tpu.memory_space<vmem>>, vector<4x256xf32>
    %c12 = arith.constant 12 : index
    %c0_15 = arith.constant 0 : index
    %16 = vector.load %arg11[%c12, %c0_15] : memref<40x256xf32, #tpu.memory_space<vmem>>, vector<4x256xf32>
    tpu.vector_store %arg11[%c12, %c0_15], %15 {strides = array<i32>} : memref<40x256xf32, #tpu.memory_space<vmem>>, vector<4x256xf32>,
    %c0_16 = arith.constant 0 : index
    %c16_17 = arith.constant 16 : index
    %17 = vector.load %arg10[%c0_16, %c16_17] : memref<4x288xf32, #tpu.memory_space<vmem>>, vector<4x256xf32>
    %c16_18 = arith.constant 16 : index
    %c0_19 = arith.constant 0 : index
    %18 = vector.load %arg11[%c16_18, %c0_19] : memref<40x256xf32, #tpu.memory_space<vmem>>, vector<4x256xf32>
    tpu.vector_store %arg11[%c16_18, %c0_19], %17 {strides = array<i32>} : memref<40x256xf32, #tpu.memory_space<vmem>>, vector<4x256xf32>,
    %c0_20 = arith.constant 0 : index
    %c17 = arith.constant 17 : index
    %19 = vector.load %arg10[%c0_20, %c17] : memref<4x288xf32, #tpu.memory_space<vmem>>, vector<4x256xf32>
    %c20 = arith.constant 20 : index
    %c0_21 = arith.constant 0 : index
    %20 = vector.load %arg11[%c20, %c0_21] : memref<40x256xf32, #tpu.memory_space<vmem>>, vector<4x256xf32>
    tpu.vector_store %arg11[%c20, %c0_21], %19 {strides = array<i32>} : memref<40x256xf32, #tpu.memory_space<vmem>>, vector<4x256xf32>,
    %c0_22 = arith.constant 0 : index
    %c25 = arith.constant 25 : index
    %21 = vector.load %arg10[%c0_22, %c25] : memref<4x288xf32, #tpu.memory_space<vmem>>, vector<4x256xf32>
    %c24 = arith.constant 24 : index
    %c0_23 = arith.constant 0 : index
    %22 = vector.load %arg11[%c24, %c0_23] : memref<40x256xf32, #tpu.memory_space<vmem>>, vector<4x256xf32>
    tpu.vector_store %arg11[%c24, %c0_23], %21 {strides = array<i32>} : memref<40x256xf32, #tpu.memory_space<vmem>>, vector<4x256xf32>,
    %c0_24 = arith.constant 0 : index
    %c26 = arith.constant 26 : index
    %23 = vector.load %arg10[%c0_24, %c26] : memref<4x288xf32, #tpu.memory_space<vmem>>, vector<4x256xf32>
    %c28 = arith.constant 28 : index
    %c0_25 = arith.constant 0 : index
    %24 = vector.load %arg11[%c28, %c0_25] : memref<40x256xf32, #tpu.memory_space<vmem>>, vector<4x256xf32>
    tpu.vector_store %arg11[%c28, %c0_25], %23 {strides = array<i32>} : memref<40x256xf32, #tpu.memory_space<vmem>>, vector<4x256xf32>,
    %c0_26 = arith.constant 0 : index
    %c27 = arith.constant 27 : index
    %25 = vector.load %arg10[%c0_26, %c27] : memref<4x288xf32, #tpu.memory_space<vmem>>, vector<4x256xf32>
    %c32 = arith.constant 32 : index
    %c0_27 = arith.constant 0 : index
    %26 = vector.load %arg11[%c32, %c0_27] : memref<40x256xf32, #tpu.memory_space<vmem>>, vector<4x256xf32>
    tpu.vector_store %arg11[%c32, %c0_27], %25 {strides = array<i32>} : memref<40x256xf32, #tpu.memory_space<vmem>>, vector<4x256xf32>,
    %c0_28 = arith.constant 0 : index
    %c0_29 = arith.constant 0 : index
    %27 = vector.load %arg2[%c0_28, %c0_29] : memref<8x40xf32, #tpu.memory_space<vmem>>, vector<8x40xf32>
    %c0_30 = arith.constant 0 : index
    %c0_31 = arith.constant 0 : index
    %28 = vector.load %arg11[%c0_30, %c0_31] : memref<40x256xf32, #tpu.memory_space<vmem>>, vector<40x256xf32>
    %cst = arith.constant dense<0.000000e+00> : vector<8x256xf32>
    %29 = tpu.matmul %27, %28, %cst {dimension_numbers = #tpu.dot_dimension_numbers<[1], [0], [0], [1], [0, 0, 1, 1], [], []>} : vector<8x40xf32>, vector<40x256xf32>, vector<8x256xf32> -> vector<8x256xf32>
    %c0_32 = arith.constant 0 : index
    %c0_33 = arith.constant 0 : index
    %30 = vector.load %arg3[%c0_32, %c0_33] : memref<8x1xf32, #tpu.memory_space<vmem>>, vector<8x1xf32>
    %31 = vector.broadcast %30 : vector<8x1xf32> to vector<8x256xf32>
    %32 = arith.mulf %29, %31 : vector<8x256xf32>
    %c0_34 = arith.constant 0 : index
    %c0_35 = arith.constant 0 : index
    %33 = vector.load %arg4[%c0_34, %c0_35] : memref<8x1xf32, #tpu.memory_space<vmem>>, vector<8x1xf32>
    %34 = vector.broadcast %33 : vector<8x1xf32> to vector<8x256xf32>
    %35 = arith.addf %32, %34 : vector<8x256xf32>
    %cst_36 = arith.constant 0.000000e+00 : f32
    %36 = vector.broadcast %cst_36 : f32 to vector<8x256xf32>
    %37 = arith.maximumf %35, %36 : vector<8x256xf32>
    %c0_37 = arith.constant 0 : index
    %c0_38 = arith.constant 0 : index
    %38 = vector.load %arg8[%c0_37, %c0_38] : memref<1x256xf32, #tpu.memory_space<vmem>>, vector<1x256xf32>
    %39 = vector.broadcast %38 : vector<1x256xf32> to vector<8x256xf32>
    %40 = arith.mulf %37, %39 : vector<8x256xf32>
    %c0_39 = arith.constant 0 : index
    %c16_40 = arith.constant 16 : index
    %41 = vector.load %arg12[%c0_39, %c16_40] : memref<8x288xf32, #tpu.memory_space<vmem>>, vector<8x256xf32>
    tpu.vector_store %arg12[%c0_39, %c16_40], %40 {strides = array<i32>} : memref<8x288xf32, #tpu.memory_space<vmem>>, vector<8x256xf32>,
    %c0_41 = arith.constant 0 : index
    %c5_42 = arith.constant 5 : index
    %42 = vector.load %arg12[%c0_41, %c5_42] : memref<8x288xf32, #tpu.memory_space<vmem>>, vector<8x256xf32>
    %c0_43 = arith.constant 0 : index
    %c0_44 = arith.constant 0 : index
    %43 = vector.load %arg13[%c0_43, %c0_44] : memref<72x256xf32, #tpu.memory_space<vmem>>, vector<8x256xf32>
    tpu.vector_store %arg13[%c0_43, %c0_44], %42 {strides = array<i32>} : memref<72x256xf32, #tpu.memory_space<vmem>>, vector<8x256xf32>,
    %c0_45 = arith.constant 0 : index
    %c6_46 = arith.constant 6 : index
    %44 = vector.load %arg12[%c0_45, %c6_46] : memref<8x288xf32, #tpu.memory_space<vmem>>, vector<8x256xf32>
    %c8_47 = arith.constant 8 : index
    %c0_48 = arith.constant 0 : index
    %45 = vector.load %arg13[%c8_47, %c0_48] : memref<72x256xf32, #tpu.memory_space<vmem>>, vector<8x256xf32>
    tpu.vector_store %arg13[%c8_47, %c0_48], %44 {strides = array<i32>} : memref<72x256xf32, #tpu.memory_space<vmem>>, vector<8x256xf32>,
    %c0_49 = arith.constant 0 : index
    %c7_50 = arith.constant 7 : index
    %46 = vector.load %arg12[%c0_49, %c7_50] : memref<8x288xf32, #tpu.memory_space<vmem>>, vector<8x256xf32>
    %c16_51 = arith.constant 16 : index
    %c0_52 = arith.constant 0 : index
    %47 = vector.load %arg13[%c16_51, %c0_52] : memref<72x256xf32, #tpu.memory_space<vmem>>, vector<8x256xf32>
    tpu.vector_store %arg13[%c16_51, %c0_52], %46 {strides = array<i32>} : memref<72x256xf32, #tpu.memory_space<vmem>>, vector<8x256xf32>,
    %c0_53 = arith.constant 0 : index
    %c15_54 = arith.constant 15 : index
    %48 = vector.load %arg12[%c0_53, %c15_54] : memref<8x288xf32, #tpu.memory_space<vmem>>, vector<8x256xf32>
    %c24_55 = arith.constant 24 : index
    %c0_56 = arith.constant 0 : index
    %49 = vector.load %arg13[%c24_55, %c0_56] : memref<72x256xf32, #tpu.memory_space<vmem>>, vector<8x256xf32>
    tpu.vector_store %arg13[%c24_55, %c0_56], %48 {strides = array<i32>} : memref<72x256xf32, #tpu.memory_space<vmem>>, vector<8x256xf32>,
    %c0_57 = arith.constant 0 : index
    %c16_58 = arith.constant 16 : index
    %50 = vector.load %arg12[%c0_57, %c16_58] : memref<8x288xf32, #tpu.memory_space<vmem>>, vector<8x256xf32>
    %c32_59 = arith.constant 32 : index
    %c0_60 = arith.constant 0 : index
    %51 = vector.load %arg13[%c32_59, %c0_60] : memref<72x256xf32, #tpu.memory_space<vmem>>, vector<8x256xf32>
    tpu.vector_store %arg13[%c32_59, %c0_60], %50 {strides = array<i32>} : memref<72x256xf32, #tpu.memory_space<vmem>>, vector<8x256xf32>,
    %c0_61 = arith.constant 0 : index
    %c17_62 = arith.constant 17 : index
    %52 = vector.load %arg12[%c0_61, %c17_62] : memref<8x288xf32, #tpu.memory_space<vmem>>, vector<8x256xf32>
    %c40 = arith.constant 40 : index
    %c0_63 = arith.constant 0 : index
    %53 = vector.load %arg13[%c40, %c0_63] : memref<72x256xf32, #tpu.memory_space<vmem>>, vector<8x256xf32>
    tpu.vector_store %arg13[%c40, %c0_63], %52 {strides = array<i32>} : memref<72x256xf32, #tpu.memory_space<vmem>>, vector<8x256xf32>,
    %c0_64 = arith.constant 0 : index
    %c25_65 = arith.constant 25 : index
    %54 = vector.load %arg12[%c0_64, %c25_65] : memref<8x288xf32, #tpu.memory_space<vmem>>, vector<8x256xf32>
    %c48 = arith.constant 48 : index
    %c0_66 = arith.constant 0 : index
    %55 = vector.load %arg13[%c48, %c0_66] : memref<72x256xf32, #tpu.memory_space<vmem>>, vector<8x256xf32>
    tpu.vector_store %arg13[%c48, %c0_66], %54 {strides = array<i32>} : memref<72x256xf32, #tpu.memory_space<vmem>>, vector<8x256xf32>,
    %c0_67 = arith.constant 0 : index
    %c26_68 = arith.constant 26 : index
    %56 = vector.load %arg12[%c0_67, %c26_68] : memref<8x288xf32, #tpu.memory_space<vmem>>, vector<8x256xf32>
    %c56 = arith.constant 56 : index
    %c0_69 = arith.constant 0 : index
    %57 = vector.load %arg13[%c56, %c0_69] : memref<72x256xf32, #tpu.memory_space<vmem>>, vector<8x256xf32>
    tpu.vector_store %arg13[%c56, %c0_69], %56 {strides = array<i32>} : memref<72x256xf32, #tpu.memory_space<vmem>>, vector<8x256xf32>,
    %c0_70 = arith.constant 0 : index
    %c27_71 = arith.constant 27 : index
    %58 = vector.load %arg12[%c0_70, %c27_71] : memref<8x288xf32, #tpu.memory_space<vmem>>, vector<8x256xf32>
    %c64 = arith.constant 64 : index
    %c0_72 = arith.constant 0 : index
    %59 = vector.load %arg13[%c64, %c0_72] : memref<72x256xf32, #tpu.memory_space<vmem>>, vector<8x256xf32>
    tpu.vector_store %arg13[%c64, %c0_72], %58 {strides = array<i32>} : memref<72x256xf32, #tpu.memory_space<vmem>>, vector<8x256xf32>,
    %c0_73 = arith.constant 0 : index
    %c0_74 = arith.constant 0 : index
    %60 = vector.load %arg5[%c0_73, %c0_74] : memref<8x72xf32, #tpu.memory_space<vmem>>, vector<8x72xf32>
    %c0_75 = arith.constant 0 : index
    %c0_76 = arith.constant 0 : index
    %61 = vector.load %arg13[%c0_75, %c0_76] : memref<72x256xf32, #tpu.memory_space<vmem>>, vector<72x256xf32>
    %cst_77 = arith.constant dense<0.000000e+00> : vector<8x256xf32>
    %62 = tpu.matmul %60, %61, %cst_77 {dimension_numbers = #tpu.dot_dimension_numbers<[1], [0], [0], [1], [0, 0, 1, 1], [], []>} : vector<8x72xf32>, vector<72x256xf32>, vector<8x256xf32> -> vector<8x256xf32>
    %c0_78 = arith.constant 0 : index
    %c0_79 = arith.constant 0 : index
    %63 = vector.load %arg6[%c0_78, %c0_79] : memref<8x1xf32, #tpu.memory_space<vmem>>, vector<8x1xf32>
    %64 = vector.broadcast %63 : vector<8x1xf32> to vector<8x256xf32>
    %65 = arith.mulf %62, %64 : vector<8x256xf32>
    %c0_80 = arith.constant 0 : index
    %c0_81 = arith.constant 0 : index
    %66 = vector.load %arg7[%c0_80, %c0_81] : memref<8x1xf32, #tpu.memory_space<vmem>>, vector<8x1xf32>
    %67 = vector.broadcast %66 : vector<8x1xf32> to vector<8x256xf32>
    %68 = arith.addf %65, %67 : vector<8x256xf32>
    %cst_82 = arith.constant 0.000000e+00 : f32
    %69 = vector.broadcast %cst_82 : f32 to vector<8x256xf32>
    %70 = arith.maximumf %68, %69 : vector<8x256xf32>
    %71 = vector.extract_strided_slice %70 {offsets = [0, 0], sizes = [8, 128], strides = [1, 1]} : vector<8x256xf32> to vector<8x128xf32>
    %c0_83 = arith.constant 0 : index
    %c0_84 = arith.constant 0 : index
    %c0_85 = arith.constant 0 : index
    %72 = vector.load %arg9[%c0_83, %c0_84, %c0_85] : memref<2x8x128xf32, #tpu.memory_space<vmem>>, vector<1x8x128xf32>
    %73 = vector.shape_cast %72 : vector<1x8x128xf32> to vector<8x128xf32>
    %74 = vector.shape_cast %71 : vector<8x128xf32> to vector<1x8x128xf32>
    tpu.vector_store %arg9[%c0_83, %c0_84, %c0_85], %74 {strides = array<i32>} : memref<2x8x128xf32, #tpu.memory_space<vmem>>, vector<1x8x128xf32>,
    %75 = vector.extract_strided_slice %70 {offsets = [0, 128], sizes = [8, 128], strides = [1, 1]} : vector<8x256xf32> to vector<8x128xf32>
    %c1_86 = arith.constant 1 : index
    %c0_87 = arith.constant 0 : index
    %c0_88 = arith.constant 0 : index
    %76 = vector.load %arg9[%c1_86, %c0_87, %c0_88] : memref<2x8x128xf32, #tpu.memory_space<vmem>>, vector<1x8x128xf32>
    %77 = vector.shape_cast %76 : vector<1x8x128xf32> to vector<8x128xf32>
    %78 = vector.shape_cast %75 : vector<8x128xf32> to vector<1x8x128xf32>
    tpu.vector_store %arg9[%c1_86, %c0_87, %c0_88], %78 {strides = array<i32>} : memref<2x8x128xf32, #tpu.memory_space<vmem>>, vector<1x8x128xf32>,
    return
  }
  func.func @transform_0(%arg0: i32) -> (i32, i32, i32) {
    %c0_i32 = arith.constant 0 : i32
    %c0_i32_0 = arith.constant 0 : i32
    %c0_i32_1 = arith.constant 0 : i32
    return %arg0, %c0_i32, %c0_i32_0 : i32, i32, i32
  }
  func.func @transform_1(%arg0: i32) -> (i32, i32) {
    %c0_i32 = arith.constant 0 : i32
    %c0_i32_0 = arith.constant 0 : i32
    %c0_i32_1 = arith.constant 0 : i32
    return %c0_i32, %c0_i32_0 : i32, i32
  }
  func.func @transform_2(%arg0: i32) -> (i32, i32) {
    %c0_i32 = arith.constant 0 : i32
    %c0_i32_0 = arith.constant 0 : i32
    %c0_i32_1 = arith.constant 0 : i32
    return %c0_i32, %c0_i32_0 : i32, i32
  }
  func.func @transform_3(%arg0: i32) -> (i32, i32) {
    %c0_i32 = arith.constant 0 : i32
    %c0_i32_0 = arith.constant 0 : i32
    %c0_i32_1 = arith.constant 0 : i32
    return %c0_i32, %c0_i32_0 : i32, i32
  }
  func.func @transform_4(%arg0: i32) -> (i32, i32) {
    %c0_i32 = arith.constant 0 : i32
    %c0_i32_0 = arith.constant 0 : i32
    %c0_i32_1 = arith.constant 0 : i32
    return %c0_i32, %c0_i32_0 : i32, i32
  }
  func.func @transform_5(%arg0: i32) -> (i32, i32) {
    %c0_i32 = arith.constant 0 : i32
    %c0_i32_0 = arith.constant 0 : i32
    %c0_i32_1 = arith.constant 0 : i32
    return %c0_i32, %c0_i32_0 : i32, i32
  }
  func.func @transform_6(%arg0: i32) -> (i32, i32) {
    %c0_i32 = arith.constant 0 : i32
    %c0_i32_0 = arith.constant 0 : i32
    %c0_i32_1 = arith.constant 0 : i32
    return %c0_i32, %c0_i32_0 : i32, i32
  }
  func.func @transform_7(%arg0: i32) -> (i32, i32) {
    %c0_i32 = arith.constant 0 : i32
    %c0_i32_0 = arith.constant 0 : i32
    %c0_i32_1 = arith.constant 0 : i32
    return %c0_i32, %c0_i32_0 : i32, i32
  }
  func.func @transform_8(%arg0: i32) -> (i32, i32, i32) {
    %c0_i32 = arith.constant 0 : i32
    %c0_i32_0 = arith.constant 0 : i32
    %c0_i32_1 = arith.constant 0 : i32
    return %arg0, %c0_i32, %c0_i32_0 : i32, i32, i32
  }
}

</mosaic_0001>

<bundles_post_ra>
// kernel: tile.8
= control target key start
LH: loop header
LB: loop body
LE: loop exit
PB: predicated region body
PF: predicated region fallthrough
CT: control target
= control target key end

     0   :  { %s22_s0 = inlined_call_operand.vmem [shape: f32[128], index: 0, kind: input, shape index: {}]   ;;  %s23_s1 = inlined_call_operand.vmem [shape: f32[2,128], index: 1, kind: output, shape index: {}]  }
   0x1   :  { %v4_v0 = vld [vmem:[%s22_s0] ss:$0 sm:$0xff] }
   0x2   :  { %5 = vst [vmem:[%s23_s1] sm:$0x3] %v4_v0 }

// kernel: down_forward.1
= control target key start
LH: loop header
LB: loop body
LE: loop exit
PB: predicated region body
PF: predicated region fallthrough
CT: control target
= control target key end

     0   :  { %v756_v1 = vmov 0.0   ;;  %vm34_vm0 = vcmask 257024   ;;  %s757_s29 = smov 16   ;;  %vm76_vm1 = vcmask 1043584   ;;  %vm77_vm2 = vcmask 130052   ;;  %s758_s10 = smov 122   ;;  %s952_s0 = inlined_call_operand.vmem [shape: f32[2,4,128], index: 0, kind: input, shape index: {}]   ;;  %s953_s2 = inlined_call_operand.vmem [shape: f32[8,1], index: 2, kind: input, shape index: {}]   ;;  %s954_s3 = inlined_call_operand.vmem [shape: f32[8,1], index: 3, kind: input, shape index: {}]   ;;  %s955_s1 = inlined_call_operand.vmem [shape: f32[8,40], index: 1, kind: input, shape index: {}]   ;;  %s956_s7 = inlined_call_operand.vmem [shape: f32[1,256], index: 7, kind: input, shape index: {}]   ;;  %s957_s5 = inlined_call_operand.vmem [shape: f32[8,1], index: 5, kind: input, shape index: {}]   ;;  %s958_s6 = inlined_call_operand.vmem [shape: f32[8,1], index: 6, kind: input, shape index: {}]   ;;  %s959_s4 = inlined_call_operand.vmem [shape: f32[8,72], index: 4, kind: input, shape index: {}]   ;;  %s960_s8 = inlined_call_operand.vmem [shape: f32[2,8,128], index: 8, kind: output, shape index: {}]  }
   0x1   :  { %v68_v0 = vld [vmem:[%s952_s0] sm:$0xf]  ;;  %33 = vst [vmem:[#allocation2] sm:$0xff] %v756_v1  ;;  %36 = vst [vmem:[#allocation3] sm:$0xff] %v756_v1  ;;  %334 = vmatprep.mubr.f32.mxu0 %v756_v1  ;;  %636 = vmatprep.mubr.f32.mxu1 %v756_v1  ;;  %v668_v2 = vld [vmem:[%s952_s0 + $0x4] sm:$0xf] }
   0x2   :  { %37 = vst [vmem:[#allocation3 + $0x8] sm:$0xff] %v756_v1  ;;  %38 = vst [vmem:[#allocation3 + $0x10] sm:$0xff] %v756_v1  ;;  %70 = vrot.lane.b32.xlu0 %v68_v0, %s757_s29  ;;  %vm73_vm3 = vcmask 130048   ;;  %s759_s0 = smov 123   ;;  %s760_s11 = smov 113   ;;  %v767_v21 = vmov 0  }
   0x3   :  { %39 = vst [vmem:[#allocation3 + $0x18] sm:$0xff] %v756_v1  ;;  %40 = vst [vmem:[#allocation3 + $0x20] sm:$0xff] %v756_v1  ;;  %s761_s12 = smov 121   ;;  %s762_s13 = smov 112   ;;  %709 = vset.pattern.permute.xlu0 %v767_v21  ;;  %v349_v22 = vld [vmem:[%s954_s3] sm:$0xff]  ;;  %708 = vset.pattern.permute.xlu1 %v767_v21  ;;  %vm100_vm5 = vcmask 1006592   ;;  %v361_v21 = vlaneseq }
   0x4   :  { %41 = vst [vmem:[#allocation3 + $0x28] sm:$0xff] %v756_v1  ;;  %42 = vst [vmem:[#allocation3 + $0x30] sm:$0xff] %v756_v1  ;;  %s763_s14 = smov 103   ;;  %s764_s15 = smov 111   ;;  %v341_v23 = vld [vmem:[%s953_s2] sm:$0xff]  ;;  %vm119_vm6 = vcmask 998400  }
   0x5   :  { %43 = vst [vmem:[#allocation3 + $0x38] sm:$0xff] %v756_v1  ;;  %44 = vst [vmem:[#allocation3 + $0x40] sm:$0xff] %v756_v1  ;;  %s765_s16 = smov 102   ;;  %s766_s17 = smov 101   ;;  %vm156_vm7 = vcmask 924672   ;;  %vm137_vm8 = vcmask 990208  }
   0x6   :  { %45 = vst [vmem:[#allocation3 + $0x48] sm:$0xff] %v756_v1  ;;  %46 = vst [vmem:[#allocation4] sm:$0xff] %v756_v1  ;;  %83 = vrot.lane.b32.xlu0 %v668_v2, %s757_s29  ;;  %vm174_vm9 = vcmask 916480   ;;  %vm193_vm10 = vcmask 908288   ;;  %vm211_vm11 = vcmask 842752   ;;  %vm230_vm12 = vcmask 834560  }
   0x7   :  { %35 = vst.msk [vmem:[#allocation2 + $0x8] sm:$0xf] %vm34_vm0, %v756_v1  ;;  %vm78_vm4 = vmor %vm77_vm2, %vm76_vm1  ;;  %vm248_vm13 = vcmask 826368   ;;  %vm266_vm14 = vcmask 326656   ;;  %vm48_vm15 = vcmask 261120   ;;  %vm383_vm0 = vcmask 1047680  }
   0x8   :  { %49 = vst.msk [vmem:[#allocation4 + $0x10] sm:$0xff] %vm48_vm15, %v756_v1  ;;  %vm568_vm1 = vcmask 588800  }
  0x74   :  { %v71_v3 = vpop.permute.xlu0 %70 }
  0x75   :  { %v72_v4 = vrot.slane %v71_v3, 4 }
  0x77   :  { %v74_v5 = vsel %vm73_vm3, %v72_v4, %v71_v3 }
  0x78   :  { %79 = vst.msk [vmem:[#allocation2] sm:$0xff] %vm78_vm4, %v74_v5  ;;  %v84_v6 = vpop.permute.xlu0 %83 }
  0x79   :  { %v85_v7 = vrot.slane %v84_v6, 4 }
  0x7b   :  { %v86_v8 = vsel %vm73_vm3, %v85_v7, %v84_v6 }
  0x7c   :  { %88 = vst.msk [vmem:[#allocation2 + $0x4] sm:$0xff] %vm78_vm4, %v86_v8 }
  0x83   :  { %v107_v9 = vld [vmem:[#allocation2] sm:$0xff]  ;;  %v90_v10 = vld [vmem:[#allocation2 + $0x8] sm:$0xf] }
  0x84   :  { %115 = vrot.lane.b32.xlu0 %v107_v9, %s758_s10  ;;  %98 = vrot.lane.b32.xlu1 %v90_v10, %s759_s0  ;;  %v127_v11 = vld [vmem:[#allocation2 + $0x8] sm:$0xf]  ;;  %v93_v14 = vcombine.high %v107_v9, %v107_v9  ;;  %v111_v17 = vcombine.low %v107_v9, %v107_v9 }
  0x85   :  { %v164_v12 = vld [vmem:[#allocation2 + $0x8] sm:$0xf] }
  0x86   :  { %v201_v13 = vld [vmem:[#allocation2 + $0x8] sm:$0xf] }
  0x87   :  { %v752_v15 = vld [vmem:[#allocation2 + $0x8] ss:$0 sps:$4 sm:$0xff]  }
  0x88   :  { %152 = vrot.lane.b32.xlu0 %v107_v9, %s760_s11  ;;  %135 = vrot.lane.b32.xlu1 %v127_v11, %s761_s12  ;;  %v753_v16 = vld [vmem:[#allocation2 + $0x8] ss:$0 sps:$4 sm:$0xff]  }
  0x89   :  { %v754_v18 = vld [vmem:[#allocation2 + $0x8] ss:$0 sps:$4 sm:$0xff]  }
  0x8a   :  { %v755_v19 = vld [vmem:[#allocation2 + $0x8] ss:$0 sps:$4 sm:$0xff]  }
  0x8b   :  { %v238_v20 = vld [vmem:[#allocation2 + $0x8] sm:$0xf] }
  0x8c   :  { %172 = vrot.lane.b32.xlu1 %v164_v12, %s762_s13  ;;  %94 = vrot.lane.b32.xlu0 %v107_v9, %s759_s0 }
  0x90   :  { %209 = vrot.lane.b32.xlu1 %v201_v13, %s763_s14  ;;  %131 = vrot.lane.b32.xlu0 %v107_v9, %s761_s12 }
  0x94   :  { %189 = vrot.lane.b32.xlu0 %v107_v9, %s764_s15  ;;  %96 = vrot.lane.b32.xlu1 %v93_v14, %s759_s0 }
  0x98   :  { %226 = vrot.lane.b32.xlu0 %v107_v9, %s765_s16  ;;  %117 = vrot.lane.b32.xlu1 %v752_v15, %s758_s10 }
  0x9c   :  { %168 = vrot.lane.b32.xlu0 %v107_v9, %s762_s13  ;;  %154 = vrot.lane.b32.xlu1 %v753_v16, %s760_s11 }
  0xa0   :  { %205 = vrot.lane.b32.xlu0 %v107_v9, %s763_s14  ;;  %113 = vrot.lane.b32.xlu1 %v111_v17, %s758_s10 }
  0xa4   :  { %133 = vrot.lane.b32.xlu0 %v93_v14, %s761_s12  ;;  %150 = vrot.lane.b32.xlu1 %v111_v17, %s760_s11 }
  0xa8   :  { %170 = vrot.lane.b32.xlu0 %v93_v14, %s762_s13  ;;  %191 = vrot.lane.b32.xlu1 %v754_v18, %s764_s15 }
  0xac   :  { %207 = vrot.lane.b32.xlu0 %v93_v14, %s763_s14  ;;  %228 = vrot.lane.b32.xlu1 %v755_v19, %s765_s16  ;;  %v255_v19 = vld [vmem:[%s955_s1] sm:$0xff] }
  0xb0   :  { %244 = vrot.lane.b32.xlu0 %v93_v14, %s766_s17  ;;  %187 = vrot.lane.b32.xlu1 %v111_v17, %s764_s15 }
  0xb4   :  { %242 = vrot.lane.b32.xlu0 %v107_v9, %s766_s17  ;;  %224 = vrot.lane.b32.xlu1 %v111_v17, %s765_s16 }
  0xb8   :  { %246 = vrot.lane.b32.xlu1 %v238_v20, %s766_s17  ;;  %352 = vperm.xlu0 %709, %v349_v22   ;;  %v362_v22 = vshrl.u32 %v361_v21, 7 }
  0xbc   :  { %344 = vperm.xlu1 %708, %v341_v23  }
  0xf6   :  { %v116_v24 = vpop.permute.xlu0 %115  ;;  %v99_v25 = vpop.permute.xlu1 %98 }
  0xfa   :  { %v153_v26 = vpop.permute.xlu0 %152  ;;  %v136_v27 = vpop.permute.xlu1 %135 }
  0xfe   :  { %v173_v28 = vpop.permute.xlu1 %172  ;;  %v95_v29 = vpop.permute.xlu0 %94 }
 0x102   :  { %v210_v30 = vpop.permute.xlu1 %209  ;;  %v132_v31 = vpop.permute.xlu0 %131 }
 0x106   :  { %v190_v32 = vpop.permute.xlu0 %189  ;;  %v97_v33 = vpop.permute.xlu1 %96 }
 0x107   :  { %v101_v34 = vsel %vm100_vm5, %v95_v29, %v97_v33  ;;  %v102_v35 = vsel %vm100_vm5, %v97_v33, %v99_v25  ;;  %v367_v33 = vsub.s32 1, %v362_v22 }
 0x108   :  { %105 = vst [vmem:[#allocation3] sm:$0xf] %v101_v34  ;;  %106 = vst [vmem:[#allocation3 + $0x8] sm:$0xf] %v102_v35 }
 0x10a   :  { %v227_v36 = vpop.permute.xlu0 %226  ;;  %v118_v37 = vpop.permute.xlu1 %117 }
 0x10b   :  { %v121_v38 = vsel %vm119_vm6, %v116_v24, %v118_v37 }
 0x10c   :  { %125 = vst [vmem:[#allocation3 + $0x8] sm:$0xf0] %v121_v38 }
 0x10e   :  { %v169_v39 = vpop.permute.xlu0 %168  ;;  %v155_v40 = vpop.permute.xlu1 %154 }
 0x10f   :  { %v158_v41 = vsel %vm156_vm7, %v153_v26, %v155_v40 }
 0x110   :  { %162 = vst [vmem:[#allocation3 + $0x18] sm:$0xf0] %v158_v41 }
 0x112   :  { %v206_v42 = vpop.permute.xlu0 %205  ;;  %v114_v43 = vpop.permute.xlu1 %113 }
 0x113   :  { %v120_v44 = vsel %vm119_vm6, %v114_v43, %v116_v24  ;;  %v257_v57 = vld [vmem:[#allocation3 + $0x8] sm:$0xff]  ;;  %v363_v24 = vsub.s32 0, %v362_v22 }
 0x114   :  { %124 = vst [vmem:[#allocation3] sm:$0xf0] %v120_v44 }
 0x116   :  { %v134_v45 = vpop.permute.xlu0 %133  ;;  %v151_v46 = vpop.permute.xlu1 %150 }
 0x117   :  { %v138_v47 = vsel %vm137_vm8, %v132_v31, %v134_v45  ;;  %v139_v48 = vsel %vm137_vm8, %v134_v45, %v136_v27  ;;  %v157_v49 = vsel %vm156_vm7, %v151_v46, %v153_v26  ;;  %v359_v27 = vld [vmem:[%s956_s7] sm:$0x3] }
 0x118   :  { %142 = vst [vmem:[#allocation3 + $0x10] sm:$0xf] %v138_v47  ;;  %143 = vst [vmem:[#allocation3 + $0x18] sm:$0xf] %v139_v48  ;;  %v368_v38 = vrot.slane %v359_v27, %v367_v33  ;;  %v643_v45 = vld [vmem:[%s957_s5] sm:$0xff] }
 0x119   :  { %161 = vst [vmem:[#allocation3 + $0x10] sm:$0xf0] %v157_v49  ;;  %v651_v46 = vld [vmem:[%s958_s6] sm:$0xff] }
 0x11a   :  { %v171_v50 = vpop.permute.xlu0 %170  ;;  %v192_v51 = vpop.permute.xlu1 %191 }
 0x11b   :  { %v175_v52 = vsel %vm174_vm9, %v169_v39, %v171_v50  ;;  %v176_v53 = vsel %vm174_vm9, %v171_v50, %v173_v28  ;;  %v195_v54 = vsel %vm193_vm10, %v190_v32, %v192_v51  ;;  %v256_v62 = vld [vmem:[#allocation3] sm:$0xff] }
 0x11c   :  { %179 = vst [vmem:[#allocation3 + $0x20] sm:$0xf] %v175_v52  ;;  %180 = vst [vmem:[#allocation3 + $0x28] sm:$0xf] %v176_v53 }
 0x11d   :  { %199 = vst [vmem:[#allocation3 + $0x28] sm:$0xf0] %v195_v54 }
 0x11e   :  { %v208_v55 = vpop.permute.xlu0 %207  ;;  %v229_v56 = vpop.permute.xlu1 %228 }
 0x11f   :  { %v212_v58 = vsel %vm211_vm11, %v206_v42, %v208_v55  ;;  %v213_v59 = vsel %vm211_vm11, %v208_v55, %v210_v30  ;;  %v232_v60 = vsel %vm230_vm12, %v227_v36, %v229_v56  ;;  %v259_v61 = vld [vmem:[#allocation3 + $0x18] sm:$0xff] }
 0x120   :  { %v258_v63 = vld [vmem:[#allocation3 + $0x10] sm:$0xff]  ;;  %216 = vst [vmem:[#allocation3 + $0x30] sm:$0xf] %v212_v58  ;;  %217 = vst [vmem:[#allocation3 + $0x38] sm:$0xf] %v213_v59  ;;  %v672_v0 = vpack.c.bf16 %v259_v61, %v257_v57 }
 0x121   :  { %236 = vst [vmem:[#allocation3 + $0x38] sm:$0xf0] %v232_v60  ;;  %v674_v2 = vpack.c.bf16 %v258_v63, %v256_v62 }
 0x122   :  { %v245_v3 = vpop.permute.xlu0 %244  ;;  %673 = vmatprep.subr.bf16.mxu0 %v672_v0  ;;  %v188_v4 = vpop.permute.xlu1 %187 }
 0x123   :  { %v194_v5 = vsel %vm193_vm10, %v188_v4, %v190_v32  ;;  %675 = vmatpush1.bf16.msra.mxu0 %v674_v2  ;;  %v364_v32 = vrot.slane %v359_v27, %v363_v24 }
 0x124   :  { %198 = vst [vmem:[#allocation3 + $0x20] sm:$0xf0] %v194_v5  ;;  %v261_v10 = vld [vmem:[#allocation3 + $0x28] sm:$0xff] }
 0x126   :  { %v243_v6 = vpop.permute.xlu0 %242  ;;  %v225_v7 = vpop.permute.xlu1 %224 }
 0x127   :  { %v249_v8 = vsel %vm248_vm13, %v243_v6, %v245_v3  ;;  %v231_v9 = vsel %vm230_vm12, %v225_v7, %v227_v36 }
 0x128   :  { %v263_v11 = vld [vmem:[#allocation3 + $0x38] sm:$0xff]  ;;  %253 = vst [vmem:[#allocation3 + $0x40] sm:$0xf] %v249_v8  ;;  %235 = vst [vmem:[#allocation3 + $0x30] sm:$0xf0] %v231_v9 }
 0x129   :  { %v676_v12 = vpack.c.bf16 %v263_v11, %v261_v10 }
 0x12a   :  { %v247_v13 = vpop.permute.xlu1 %246 }
 0x12b   :  { %677 = vmatprep.subr.bf16.mxu0 %v676_v12  ;;  %v250_v14 = vsel %vm248_vm13, %v245_v3, %v247_v13  ;;  %v260_v15 = vld [vmem:[#allocation3 + $0x20] sm:$0xff] }
 0x12c   :  { %254 = vst [vmem:[#allocation3 + $0x48] sm:$0xf] %v250_v14 }
 0x12f   :  { %v262_v16 = vld [vmem:[#allocation3 + $0x30] sm:$0xff]  ;;  %v264_v20 = vld [vmem:[#allocation3 + $0x40] sm:$0xff] }
 0x130   :  { %v678_v17 = vpack.c.bf16 %v262_v16, %v260_v15 }
 0x132   :  { %679 = vmatpush1.bf16.msra.mxu0 %v678_v17 }
 0x133   :  { %v265_v18 = vld [vmem:[#allocation3 + $0x48] sm:$0xff] }
 0x134   :  { %278 = vmatprep.subr.mxu0 %v265_v18 }
 0x136   :  { %279 = vmatpush1.msra.mxu0 %v264_v20 }
 0x137   :  { %669 = vmatmul.mubr.msk.f32.vlgmr.msra.gmra.mrb[0].mxu0 %vm266_vm14, %v255_v19  ;;  %v353_v26 = vpop.permute.xlu0 %352 }
 0x13b   :  { %v345_v23 = vpop.permute.xlu1 %344 }
 0x20a   :  { %v336_v25 = vpop.f32.mrb[0].mxu0 }
 0x20b   :  { %v347_v28 = vmul.f32 %v345_v23, %v336_v25  ;;  %v338_v29 = vpop.f32.mrb[1].mxu0 }
 0x20c   :  { %v348_v30 = vmul.f32 %v345_v23, %v338_v29 }
 0x20d   :  { %v355_v31 = vadd.f32 %v353_v26, %v347_v28 }
 0x20e   :  { %v356_v34 = vadd.f32 %v353_v26, %v348_v30 }
 0x20f   :  { %v357_v35 = vmax.f32 %v355_v31, 0.0 }
 0x210   :  { %v358_v36 = vmax.f32 %v356_v34, 0.0 }
 0x211   :  { %v371_v37 = vmul.f32 %v364_v32, %v357_v35 }
 0x212   :  { %v372_v1 = vmul.f32 %v368_v38, %v358_v36 }
 0x213   :  { %375 = vrot.lane.b32.xlu1 %v371_v37, %s757_s29 }
 0x217   :  { %377 = vrot.lane.b32.xlu1 %v372_v1, %s757_s29 }
 0x285   :  { %v376_v39 = vpop.permute.xlu1 %375 }
 0x286   :  { %384 = vst.msk [vmem:[#allocation4] sm:$0xff] %vm383_vm0, %v376_v39 }
 0x289   :  { %v378_v40 = vpop.permute.xlu1 %377 }
 0x28a   :  { %v379_v41 = vsel %vm73_vm3, %v376_v39, %v378_v40  ;;  %386 = vst.msk [vmem:[#allocation4 + $0x10] sm:$0xff] %vm73_vm3, %v378_v40 }
 0x28d   :  { %v405_v42 = vld [vmem:[#allocation4] sm:$0xff] }
 0x28e   :  { %411 = vrot.lane.b32.xlu1 %v405_v42, %s758_s10  ;;  %393 = vrot.lane.b32.xlu0 %v405_v42, %s759_s0 }
 0x291   :  { %v407_v43 = vld [vmem:[#allocation4 + $0x10] sm:$0xff] }
 0x292   :  { %447 = vrot.lane.b32.xlu1 %v405_v42, %s760_s11  ;;  %429 = vrot.lane.b32.xlu0 %v405_v42, %s761_s12  ;;  %v715_v44 = vpack.i.bf16 %v407_v43, %v379_v41 }
 0x296   :  { %483 = vrot.lane.b32.xlu1 %v405_v42, %s764_s15  ;;  %465 = vrot.lane.b32.xlu0 %v405_v42, %s762_s13 }
 0x29a   :  { %501 = vrot.lane.b32.xlu0 %v405_v42, %s763_s14  ;;  %716 = vrot.lane.b32.xlu1 %v715_v44, %s758_s10 }
 0x29e   :  { %726 = vrot.lane.b32.xlu1 %v715_v44, %s760_s11  ;;  %711 = vrot.lane.b32.xlu0 %v715_v44, %s759_s0 }
 0x2a2   :  { %736 = vrot.lane.b32.xlu1 %v715_v44, %s764_s15  ;;  %721 = vrot.lane.b32.xlu0 %v715_v44, %s761_s12 }
 0x2a6   :  { %746 = vrot.lane.b32.xlu1 %v715_v44, %s765_s16  ;;  %731 = vrot.lane.b32.xlu0 %v715_v44, %s762_s13 }
 0x2aa   :  { %519 = vrot.lane.b32.xlu1 %v405_v42, %s765_s16  ;;  %741 = vrot.lane.b32.xlu0 %v715_v44, %s763_s14  ;;  %v549_v44 = vld [vmem:[%s959_s4] sm:$0xff] }
 0x2ae   :  { %541 = vrot.lane.b32.xlu1 %v407_v43, %s766_s17  ;;  %539 = vrot.lane.b32.xlu0 %v379_v41, %s766_s17 }
 0x2b2   :  { %646 = vperm.xlu1 %708, %v643_v45   ;;  %537 = vrot.lane.b32.xlu0 %v405_v42, %s766_s17 }
 0x2b6   :  { %654 = vperm.xlu0 %709, %v651_v46  }
 0x300   :  { %v394_v47 = vpop.permute.xlu0 %393  ;;  %v412_v48 = vpop.permute.xlu1 %411 }
 0x304   :  { %v430_v49 = vpop.permute.xlu0 %429  ;;  %v448_v50 = vpop.permute.xlu1 %447 }
 0x308   :  { %v466_v51 = vpop.permute.xlu0 %465  ;;  %v484_v52 = vpop.permute.xlu1 %483 }
 0x30c   :  { %v502_v53 = vpop.permute.xlu0 %501  ;;  %v717_v54 = vpop.permute.xlu1 %716 }
 0x30d   :  { %v719_v55 = vunpack.i.h.bf16 %v717_v54  ;;  %v718_v56 = vunpack.i.l.bf16 %v717_v54 }
 0x30f   :  { %v418_v61 = vsel %vm119_vm6, %v718_v56, %v719_v55  ;;  %v417_v62 = vsel %vm119_vm6, %v412_v48, %v718_v56 }
 0x310   :  { %v712_v57 = vpop.permute.xlu0 %711  ;;  %v727_v58 = vpop.permute.xlu1 %726 }
 0x311   :  { %v714_v59 = vunpack.i.h.bf16 %v712_v57  ;;  %v713_v60 = vunpack.i.l.bf16 %v712_v57  ;;  %v729_v63 = vunpack.i.h.bf16 %v727_v58  ;;  %v728_v0 = vunpack.i.l.bf16 %v727_v58 }
 0x313   :  { %v400_v2 = vsel %vm100_vm5, %v713_v60, %v714_v59  ;;  %v399_v3 = vsel %vm100_vm5, %v394_v47, %v713_v60  ;;  %v454_v13 = vsel %vm156_vm7, %v728_v0, %v729_v63  ;;  %v453_v15 = vsel %vm156_vm7, %v448_v50, %v728_v0 }
 0x314   :  { %v722_v4 = vpop.permute.xlu0 %721  ;;  %v737_v5 = vpop.permute.xlu1 %736  ;;  %v680_v6 = vpack.c.bf16 %v418_v61, %v400_v2  ;;  %v682_v7 = vpack.c.bf16 %v417_v62, %v399_v3 }
 0x315   :  { %v724_v8 = vunpack.i.h.bf16 %v722_v4  ;;  %v723_v9 = vunpack.i.l.bf16 %v722_v4  ;;  %v739_v10 = vunpack.i.h.bf16 %v737_v5  ;;  %v738_v11 = vunpack.i.l.bf16 %v737_v5 }
 0x316   :  { %681 = vmatprep.subr.bf16.mxu1 %v680_v6 }
 0x317   :  { %683 = vmatpush1.bf16.msra.mxu1 %v682_v7  ;;  %v436_v12 = vsel %vm137_vm8, %v723_v9, %v724_v8  ;;  %v435_v14 = vsel %vm137_vm8, %v430_v49, %v723_v9  ;;  %v490_v22 = vsel %vm193_vm10, %v738_v11, %v739_v10  ;;  %v489_v23 = vsel %vm193_vm10, %v484_v52, %v738_v11 }
 0x318   :  { %v732_v16 = vpop.permute.xlu0 %731  ;;  %v747_v17 = vpop.permute.xlu1 %746  ;;  %v684_v18 = vpack.c.bf16 %v454_v13, %v436_v12  ;;  %v686_v19 = vpack.c.bf16 %v453_v15, %v435_v14 }
 0x319   :  { %v734_v20 = vunpack.i.h.bf16 %v732_v16  ;;  %v733_v21 = vunpack.i.l.bf16 %v732_v16  ;;  %v749_v24 = vunpack.i.h.bf16 %v747_v17  ;;  %v748_v25 = vunpack.i.l.bf16 %v747_v17 }
 0x31a   :  { %685 = vmatprep.subr.bf16.mxu1 %v684_v18 }
 0x31b   :  { %687 = vmatpush1.bf16.msra.mxu1 %v686_v19  ;;  %v472_v26 = vsel %vm174_vm9, %v733_v21, %v734_v20  ;;  %v471_v27 = vsel %vm174_vm9, %v466_v51, %v733_v21  ;;  %v526_v37 = vsel %vm230_vm12, %v748_v25, %v749_v24 }
 0x31c   :  { %v742_v28 = vpop.permute.xlu0 %741  ;;  %v520_v29 = vpop.permute.xlu1 %519  ;;  %v688_v30 = vpack.c.bf16 %v490_v22, %v472_v26  ;;  %v690_v31 = vpack.c.bf16 %v489_v23, %v471_v27 }
 0x31d   :  { %v744_v32 = vunpack.i.h.bf16 %v742_v28  ;;  %v743_v33 = vunpack.i.l.bf16 %v742_v28  ;;  %v525_v35 = vsel %vm230_vm12, %v520_v29, %v748_v25 }
 0x31e   :  { %689 = vmatprep.subr.bf16.mxu1 %v688_v30 }
 0x31f   :  { %v507_v34 = vsel %vm211_vm11, %v502_v53, %v743_v33  ;;  %691 = vmatpush1.bf16.msra.mxu1 %v690_v31  ;;  %v508_v36 = vsel %vm211_vm11, %v743_v33, %v744_v32 }
 0x320   :  { %v694_v38 = vpack.c.bf16 %v525_v35, %v507_v34  ;;  %v540_v1 = vpop.permute.xlu0 %539  ;;  %v542_v39 = vpop.permute.xlu1 %541  ;;  %v692_v40 = vpack.c.bf16 %v526_v37, %v508_v36 }
 0x321   :  { %v544_v41 = vsel %vm248_vm13, %v540_v1, %v542_v39 }
 0x322   :  { %693 = vmatprep.subr.bf16.mxu1 %v692_v40 }
 0x323   :  { %695 = vmatpush1.bf16.msra.mxu1 %v694_v38 }
 0x324   :  { %v538_v42 = vpop.permute.xlu0 %537  ;;  %588 = vmatprep.subr.mxu1 %v544_v41 }
 0x325   :  { %v543_v43 = vsel %vm248_vm13, %v538_v42, %v540_v1 }
 0x327   :  { %589 = vmatpush1.msra.mxu1 %v543_v43 }
 0x328   :  { %670 = vmatmul.mubr.msk.f32.vlgmr.msra.gmra.mrb[0].mxu1 %vm568_vm1, %v549_v44 }
 0x331   :  { %v647_v45 = vpop.permute.xlu1 %646 }
 0x335   :  { %v655_v49 = vpop.permute.xlu0 %654 }
 0x3fb   :  { %v638_v46 = vpop.f32.mrb[0].mxu1 }
 0x3fc   :  { %v649_v47 = vmul.f32 %v647_v45, %v638_v46  ;;  %v640_v48 = vpop.f32.mrb[1].mxu1 }
 0x3fd   :  { %v650_v50 = vmul.f32 %v647_v45, %v640_v48 }
 0x3fe   :  { %v657_v51 = vadd.f32 %v655_v49, %v649_v47 }
 0x3ff   :  { %v658_v52 = vadd.f32 %v655_v49, %v650_v50 }
 0x400   :  { %v659_v53 = vmax.f32 %v657_v51, 0.0 }
 0x401   :  { %v660_v54 = vmax.f32 %v658_v52, 0.0 }
 0x402   :  { %661 = vst [vmem:[%s960_s8] sm:$0xff] %v659_v53 }
 0x403   :  { %671 = vst [vmem:[%s960_s8 + $0x8] sm:$0xff] %v660_v54 }

</bundles_post_ra>
